<compile_context>
chip_gen: v7x
topology: tpu7x:2x2x1
jax: 0.10.0
libtpu: 0.0.40
codegen_flags: <defaults>
</compile_context>

<pallas_src>
import jax
import jax.numpy as jnp
from jax.experimental import pallas as pl
from jax.experimental.pallas import tpu as pltpu

NEG_SLOPE = 0.01          # F.leaky_relu default
NEG_BIG = -1e30           # finite "-inf": keeps all-masked rows NaN-free
_MiB = 1024 * 1024


def _round_up(x, m):
    return ((x + m - 1) // m) * m


def _chip_vmem_bytes():
    """Physical VMEM per TensorCore; fall back to 128 MiB (v5e/v6e) if unknown."""
    try:
        return int(pltpu.get_tpu_info().vmem_capacity_bytes)
    except Exception:
        return 128 * _MiB


def _default_tiling(vmem_bytes):
    """(block_n, vmem_limit_bytes) per TPU generation."""
    if vmem_bytes <= 64 * _MiB:
        # v7x: 64 MiB VMEM per TensorCore -> smaller tiles, modest scoped limit.
        return 1024, 44 * _MiB
    # v5e / v6e: 128 MiB physical VMEM.  Big tiles cut both the O(N^2*d/bn)
    # z_src HBM re-reads and the ~0.35us/step grid overhead over n_blk^2 steps.
    return 2048, 96 * _MiB


# ------------------- kernel 1: projection + per-node attention scores -------------------
def _project_kernel(h_ref, w_ref, asrc_ref, adst_ref,
                    z_ref, zb_ref, ss_ref, sd_ref):
    """z = h @ W^T (bf16 MXU, f32 accumulation over tiled K) + hoisted scores."""
    k = pl.program_id(1)

    @pl.when(k == 0)
    def _init():
        z_ref[...] = jnp.zeros_like(z_ref)

    # bf16 operands, f32 accumulation directly in the resident f32 output block.
    z_ref[...] += jnp.dot(h_ref[...].astype(jnp.bfloat16), w_ref[...],
                          preferred_element_type=jnp.float32)

    @pl.when(k == pl.num_programs(1) - 1)
    def _finalize():
        z = z_ref[...]
        zb_ref[...] = z.astype(jnp.bfloat16)           # bf16 copy for kernel 2
        # Per-node scores, computed ONCE here (VPU mul + XLU lane reduce),
        # instead of per (dst, src) tile inside the attention kernel.
        ss_ref[...] = jnp.sum(z * asrc_ref[...], axis=-1, keepdims=True)
        sd_ref[...] = jnp.sum(z * adst_ref[...], axis=-1, keepdims=True)


# --------------------- kernel 2: edge attention + aggregation -------------------
def _attn_kernel(zs_ref, sdst_ref, ssrc_ref, adjt_ref, o_ref, m_scr, l_scr):
    """One (dst_tile, src_tile) step of the online-softmax aggregation.

    o_ref is the accumulator itself (resident across the src axis)."""
    s = pl.program_id(1)

    @pl.when(s == 0)
    def _init():
        m_scr[...] = jnp.full_like(m_scr, NEG_BIG)
        l_scr[...] = jnp.zeros_like(l_scr)
        o_ref[...] = jnp.zeros_like(o_ref)

    # e[j, i] = leaky_relu(s_src[i] + s_dst[j]) for edge i -> j, masked to edges.
    e = sdst_ref[...] + ssrc_ref[...]                   # (bn,1)+(1,bn) -> (bn,bn)
    e = jnp.maximum(e, NEG_SLOPE * e)                   # leaky_relu (mul + max)
    # NOTE: zero in-degree dst rows fall back to a uniform average over all
    # sources instead of NaN; the layer assumes self-loops (well-formed graph).
    e = jnp.where(adjt_ref[...] > 0, e, NEG_BIG)        # mask non-edges (int8 adj)

    # Online (flash-style) softmax over the src axis (lanes), all math in f32
    # (v5e has no bf16 VPU/EUP); only the MXU operands below are bf16.
    m_prev = m_scr[...]
    m_new = jnp.maximum(m_prev, jnp.max(e, axis=-1, keepdims=True))
    corr = jnp.exp(m_prev - m_new)
    p = jnp.exp(e - m_new)              # masked entries underflow to exactly 0
    l_scr[...] = corr * l_scr[...] + jnp.sum(p, axis=-1, keepdims=True)
    o_ref[...] = corr * o_ref[...] + jnp.dot(
        p.astype(jnp.bfloat16), zs_ref[...],            # bf16 x bf16 -> f32 MXU
        preferred_element_type=jnp.float32)
    m_scr[...] = m_new

    @pl.when(s == pl.num_programs(1) - 1)
    def _finalize():
        # Exact normalization: runs once per dst block, so no approx reciprocal.
        o_ref[...] = o_ref[...] / l_scr[...]


def gat_layer_forward(h, adj, w_fc, a_attn, *, block_n=None):
    """Pallas-backed GATLayer.forward.

    Args:
      h:      (N, in_dim)   node features.
      adj:    (N, N)        adjacency, adj[i, j] != 0 iff edge i -> j.
      w_fc:   (out_dim, in_dim)   fc.weight      (PyTorch layout, no bias).
      a_attn: (1, 2*out_dim)      attn_fc.weight (PyTorch layout, no bias).
      block_n: node tile size (default: derived from the TPU generation).

    Returns:
      z      (N, out_dim): what forward() returns (g.ndata['z']).
      h_agg  (N, out_dim): attention-aggregated features (g.ndata['h']).
    """
    h = jnp.asarray(h, jnp.float32)
    w_fc = jnp.asarray(w_fc, jnp.float32)
    a_attn = jnp.asarray(a_attn, jnp.float32)

    N, in_dim = h.shape
    out_dim = w_fc.shape[0]

    vmem_bytes = _chip_vmem_bytes()
    bn_default, vmem_limit = _default_tiling(vmem_bytes)
    if block_n is None:
        block_n = bn_default
        # v7x megacore: the dst axis is "parallel" across 2 TensorCores; make
        # sure there are >= 2 dst blocks when the graph is big enough to split.
        if vmem_bytes <= 64 * _MiB and N > 256:
            block_n = min(block_n, _round_up((N + 1) // 2, 128))

    # Lane-dense padded sizes (feature dims -> multiples of 128).
    d_p = _round_up(out_dim, 128)
    k_p = _round_up(in_dim, 128)
    tk = min(k_p, 512)                       # K tile for kernel 1
    k_p = _round_up(k_p, tk)
    k_blk = k_p // tk
    bn = min(_round_up(block_n, 128), _round_up(N, 128))
    n_p = _round_up(N, bn)
    n_blk = n_p // bn

    # Zero padding is semantically inert: padded feature columns hit zero
    # weights, padded src/dst nodes carry no edges and are sliced off below.
    # TODO(synk): for repeated layer invocations, hoist/cache these O(N^2) pad /
    # transpose / int8-cast passes (or accept a pre-transposed int8 adjacency).
    h_p = jnp.zeros((n_p, k_p), jnp.float32).at[:N, :in_dim].set(h)
    w_t = jnp.zeros((k_p, d_p), jnp.bfloat16).at[:in_dim, :out_dim].set(
        w_fc.T.astype(jnp.bfloat16))
    a_src = jnp.zeros((1, d_p), jnp.float32).at[0, :out_dim].set(a_attn[0, :out_dim])
    a_dst = jnp.zeros((1, d_p), jnp.float32).at[0, :out_dim].set(a_attn[0, out_dim:])
    # dst-major int8 adjacency: 4x less HBM traffic than f32, already in the
    # (T_dst, T_src) orientation the kernel consumes.
    adj_t = jnp.zeros((n_p, n_p), jnp.int8).at[:N, :N].set(
        (jnp.asarray(adj).T != 0).astype(jnp.int8))

    proj_params = pltpu.CompilerParams(
        dimension_semantics=("parallel", "arbitrary"),   # rows parallel, K reduction
        vmem_limit_bytes=vmem_limit)
    attn_params = pltpu.CompilerParams(
        dimension_semantics=("parallel", "arbitrary"),   # dst across cores, src reduction
        vmem_limit_bytes=vmem_limit)

    # ---------------- kernel 1: z = h @ W^T  (+ hoisted per-node scores) ----------------
    z_f32, z_bf16, s_src_col, s_dst_col = pl.pallas_call(
        _project_kernel,
        out_shape=(
            jax.ShapeDtypeStruct((n_p, d_p), jnp.float32),    # z (returned)
            jax.ShapeDtypeStruct((n_p, d_p), jnp.bfloat16),   # z for kernel 2
            jax.ShapeDtypeStruct((n_p, 1), jnp.float32),      # s_src = z . a_src
            jax.ShapeDtypeStruct((n_p, 1), jnp.float32),      # s_dst = z . a_dst
        ),
        grid_spec=pltpu.PrefetchScalarGridSpec(
            num_scalar_prefetch=0, grid=(n_blk, k_blk),
            in_specs=[
                pl.BlockSpec((bn, tk), lambda i, k: (i, k)),     # h tile
                pl.BlockSpec((tk, d_p), lambda i, k: (k, 0)),    # W^T tile (bf16)
                pl.BlockSpec((1, d_p), lambda i, k: (0, 0)),     # a_src (resident)
                pl.BlockSpec((1, d_p), lambda i, k: (0, 0)),     # a_dst (resident)
            ],
            out_specs=[
                pl.BlockSpec((bn, d_p), lambda i, k: (i, 0)),
                pl.BlockSpec((bn, d_p), lambda i, k: (i, 0)),
                pl.BlockSpec((bn, 1), lambda i, k: (i, 0)),
                pl.BlockSpec((bn, 1), lambda i, k: (i, 0)),
            ]),
        compiler_params=proj_params,
    )(h_p, w_t, a_src, a_dst)

    # (1, n_p) row layout for the per-src score: cheap O(N) reshape of contiguous data.
    s_src_row = s_src_col.reshape(1, n_p)

    # -------- kernel 2: attention + aggregation (online softmax over src) --------
    # TODO(synk): sweep pipeline_mode=pl.Buffered(3) on the z_src / adj specs if
    # the profiler shows exposed DMA after the bf16 + score-hoist changes.
    hagg_p = pl.pallas_call(
        _attn_kernel,
        out_shape=jax.ShapeDtypeStruct((n_p, d_p), jnp.float32),
        grid_spec=pltpu.PrefetchScalarGridSpec(
            num_scalar_prefetch=0, grid=(n_blk, n_blk),
            in_specs=[
                pl.BlockSpec((bn, d_p), lambda d, s: (s, 0)),   # z_src (bf16)
                pl.BlockSpec((bn, 1), lambda d, s: (d, 0)),     # s_dst (resident per dst block)
                pl.BlockSpec((1, bn), lambda d, s: (0, s)),     # s_src row slice
                pl.BlockSpec((bn, bn), lambda d, s: (d, s)),    # adj^T tile, int8
            ],
            out_specs=pl.BlockSpec((bn, d_p), lambda d, s: (d, 0)),
            scratch_shapes=[
                pltpu.VMEM((bn, 1), jnp.float32),    # running max
                pltpu.VMEM((bn, 1), jnp.float32),    # running denom
            ]),
        compiler_params=attn_params,
    )(z_bf16, s_dst_col, s_src_row, adj_t)

    return z_f32[:N, :out_dim], hagg_p[:N, :out_dim]


def gat_layer_reference(h, adj, w_fc, a_attn):
    """Pure-JAX f32 reference of the same computation."""
    out_dim = w_fc.shape[0]
    z = h @ w_fc.T
    a_src = a_attn[0, :out_dim]
    a_dst = a_attn[0, out_dim:]
    e = (z @ a_src)[:, None] + (z @ a_dst)[None, :]       # e[i, j], edge i -> j
    e = jnp.where(e > 0, e, NEG_SLOPE * e)
    mask = adj > 0
    e = jnp.where(mask, e, -jnp.inf)
    p = jnp.where(mask, jnp.exp(e - jnp.max(e, axis=0, keepdims=True)), 0.0)
    alpha = p / jnp.sum(p, axis=0, keepdims=True)
    h_agg = alpha.T @ z
    return z, h_agg


if __name__ == "__main__":
    N, in_dim, out_dim = 384, 16, 32   # 3x3 tile grid at block_n=128

    key = jax.random.PRNGKey(0)
    k_h, k_w, k_a, k_adj = jax.random.split(key, 4)

    # Synthetic parameters matching __init__ shapes:
    #   fc:      Linear(in_dim, out_dim, bias=False)  -> weight (out_dim, in_dim)
    #   attn_fc: Linear(2*out_dim, 1, bias=False)     -> weight (1, 2*out_dim)
    w_fc = jax.random.normal(k_w, (out_dim, in_dim), jnp.float32) * 0.1
    a_attn = jax.random.normal(k_a, (1, 2 * out_dim), jnp.float32) * 0.1
    h = jax.random.normal(k_h, (N, in_dim), jnp.float32)

    # ~10% random graph + self-loops (every node receives >= 1 message, as in
    # a well-formed DGL graph for this layer).
    adj = (jax.random.uniform(k_adj, (N, N)) > 0.9).astype(jnp.float32)
    adj = jnp.maximum(adj, jnp.eye(N, dtype=jnp.float32))

    # block_n=128 exercises the multi-tile online-softmax path at this small N;
    # pass block_n=None in production to get generation-aware tile sizes.
    z, h_agg = gat_layer_forward(h, adj, w_fc, a_attn, block_n=128)
    jax.block_until_ready((z, h_agg))

    z_ref, h_agg_ref = gat_layer_reference(h, adj, w_fc, a_attn)

    # bf16 MXU operands -> loosened tolerances vs the pure-f32 reference.
    assert jnp.allclose(z, z_ref, atol=3e-2, rtol=3e-2), "z mismatch"
    assert jnp.allclose(h_agg, h_agg_ref, atol=5e-2, rtol=5e-2), "h_agg mismatch"

    print("KERNEL_OK")
</pallas_src>

<mosaic_0001>
module attributes {stable_mosaic.version = 11 : i64} {
  func.func @_project_kernel(%arg0: i32, %arg1: i32, %arg2: memref<128x128xf32, #tpu.memory_space<vmem>>, %arg3: memref<128x128xbf16, #tpu.memory_space<vmem>>, %arg4: memref<1x128xf32, #tpu.memory_space<vmem>>, %arg5: memref<1x128xf32, #tpu.memory_space<vmem>>, %arg6: memref<128x128xf32, #tpu.memory_space<vmem>>, %arg7: memref<128x128xbf16, #tpu.memory_space<vmem>>, %arg8: memref<128x1xf32, #tpu.memory_space<vmem>>, %arg9: memref<128x1xf32, #tpu.memory_space<vmem>>) attributes {dimension_semantics = [#tpu.dimension_semantics<parallel>, #tpu.dimension_semantics<arbitrary>], iteration_bounds = array<i64: 3, 1>, scalar_prefetch = 0 : i64, scratch_operands = 0 : i64, tpu.core_type = #tpu.core_type<tc>, window_params = [{transform_indices = @transform_0, window_bounds = array<i64: 128, 128>}, {transform_indices = @transform_1, window_bounds = array<i64: 128, 128>}, {pipeline_mode = #tpu.pipeline_mode<synchronous>, transform_indices = @transform_2, window_bounds = array<i64: 1, 128>}, {pipeline_mode = #tpu.pipeline_mode<synchronous>, transform_indices = @transform_3, window_bounds = array<i64: 1, 128>}, {transform_indices = @transform_4, window_bounds = array<i64: 128, 128>}, {transform_indices = @transform_5, window_bounds = array<i64: 128, 128>}, {transform_indices = @transform_6, window_bounds = array<i64: 128, 1>}, {transform_indices = @transform_7, window_bounds = array<i64: 128, 1>}]} {
    %c0_i32 = arith.constant 0 : i32
    %0 = arith.cmpi eq, %arg1, %c0_i32 : i32
    %1 = arith.extui %0 : i1 to i32
    %c0_i32_0 = arith.constant 0 : i32
    %2 = arith.cmpi ne, %1, %c0_i32_0 : i32
    scf.if %2 {
      %cst_10 = arith.constant 0.000000e+00 : f32
      %13 = vector.broadcast %cst_10 : f32 to vector<128x128xf32>
      %c0_11 = arith.constant 0 : index
      %c0_12 = arith.constant 0 : index
      %14 = vector.load %arg6[%c0_11, %c0_12] : memref<128x128xf32, #tpu.memory_space<vmem>>, vector<128x128xf32>
      tpu.vector_store %arg6[%c0_11, %c0_12], %13 {strides = array<i32>} : memref<128x128xf32, #tpu.memory_space<vmem>>, vector<128x128xf32>,
    } else {
    }
    %c0 = arith.constant 0 : index
    %c0_1 = arith.constant 0 : index
    %3 = vector.load %arg6[%c0, %c0_1] : memref<128x128xf32, #tpu.memory_space<vmem>>, vector<128x128xf32>
    %c0_2 = arith.constant 0 : index
    %c0_3 = arith.constant 0 : index
    %4 = vector.load %arg2[%c0_2, %c0_3] : memref<128x128xf32, #tpu.memory_space<vmem>>, vector<128x128xf32>
    %5 = arith.truncf %4 : vector<128x128xf32> to vector<128x128xbf16>
    %c0_4 = arith.constant 0 : index
    %c0_5 = arith.constant 0 : index
    %6 = vector.load %arg3[%c0_4, %c0_5] : memref<128x128xbf16, #tpu.memory_space<vmem>>, vector<128x128xbf16>
    %cst = arith.constant dense<0.000000e+00> : vector<128x128xf32>
    %7 = tpu.matmul %5, %6, %cst {dimension_numbers = #tpu.dot_dimension_numbers<[1], [0], [0], [1], [0, 0, 1, 1], [], []>} : vector<128x128xbf16>, vector<128x128xbf16>, vector<128x128xf32> -> vector<128x128xf32>
    %8 = arith.addf %3, %7 : vector<128x128xf32>
    %c0_6 = arith.constant 0 : index
    %c0_7 = arith.constant 0 : index
    %9 = vector.load %arg6[%c0_6, %c0_7] : memref<128x128xf32, #tpu.memory_space<vmem>>, vector<128x128xf32>
    tpu.vector_store %arg6[%c0_6, %c0_7], %8 {strides = array<i32>} : memref<128x128xf32, #tpu.memory_space<vmem>>, vector<128x128xf32>,
    %c0_i32_8 = arith.constant 0 : i32
    %10 = arith.cmpi eq, %arg1, %c0_i32_8 : i32
    %11 = arith.extui %10 : i1 to i32
    %c0_i32_9 = arith.constant 0 : i32
    %12 = arith.cmpi ne, %11, %c0_i32_9 : i32
    scf.if %12 {
      %c0_10 = arith.constant 0 : index
      %c0_11 = arith.constant 0 : index
      %13 = vector.load %arg6[%c0_10, %c0_11] : memref<128x128xf32, #tpu.memory_space<vmem>>, vector<128x128xf32>
      %14 = arith.truncf %13 : vector<128x128xf32> to vector<128x128xbf16>
      %c0_12 = arith.constant 0 : index
      %c0_13 = arith.constant 0 : index
      %15 = vector.load %arg7[%c0_12, %c0_13] : memref<128x128xbf16, #tpu.memory_space<vmem>>, vector<128x128xbf16>
      tpu.vector_store %arg7[%c0_12, %c0_13], %14 {strides = array<i32>} : memref<128x128xbf16, #tpu.memory_space<vmem>>, vector<128x128xbf16>,
      %c0_14 = arith.constant 0 : index
      %c0_15 = arith.constant 0 : index
      %16 = vector.load %arg4[%c0_14, %c0_15] : memref<1x128xf32, #tpu.memory_space<vmem>>, vector<1x128xf32>
      %17 = vector.broadcast %16 : vector<1x128xf32> to vector<128x128xf32>
      %18 = arith.mulf %13, %17 : vector<128x128xf32>
      %cst_16 = arith.constant dense<0.000000e+00> : vector<128xf32>
      %19 = vector.multi_reduction <add>, %18, %cst_16 [1] : vector<128x128xf32> to vector<128xf32>
      %20 = vector.shape_cast %19 : vector<128xf32> to vector<128x1xf32>
      %c0_17 = arith.constant 0 : index
      %c0_18 = arith.constant 0 : index
      %21 = vector.load %arg8[%c0_17, %c0_18] : memref<128x1xf32, #tpu.memory_space<vmem>>, vector<128x1xf32>
      tpu.vector_store %arg8[%c0_17, %c0_18], %20 {strides = array<i32>} : memref<128x1xf32, #tpu.memory_space<vmem>>, vector<128x1xf32>,
      %c0_19 = arith.constant 0 : index
      %c0_20 = arith.constant 0 : index
      %22 = vector.load %arg5[%c0_19, %c0_20] : memref<1x128xf32, #tpu.memory_space<vmem>>, vector<1x128xf32>
      %23 = vector.broadcast %22 : vector<1x128xf32> to vector<128x128xf32>
      %24 = arith.mulf %13, %23 : vector<128x128xf32>
      %cst_21 = arith.constant dense<0.000000e+00> : vector<128xf32>
      %25 = vector.multi_reduction <add>, %24, %cst_21 [1] : vector<128x128xf32> to vector<128xf32>
      %26 = vector.shape_cast %25 : vector<128xf32> to vector<128x1xf32>
      %c0_22 = arith.constant 0 : index
      %c0_23 = arith.constant 0 : index
      %27 = vector.load %arg9[%c0_22, %c0_23] : memref<128x1xf32, #tpu.memory_space<vmem>>, vector<128x1xf32>
      tpu.vector_store %arg9[%c0_22, %c0_23], %26 {strides = array<i32>} : memref<128x1xf32, #tpu.memory_space<vmem>>, vector<128x1xf32>,
    } else {
    }
    return
  }
  func.func @transform_0(%arg0: i32, %arg1: i32) -> (i32, i32) {
    %c0_i32 = arith.constant 0 : i32
    return %arg0, %arg1 : i32, i32
  }
  func.func @transform_1(%arg0: i32, %arg1: i32) -> (i32, i32) {
    %c0_i32 = arith.constant 0 : i32
    %c0_i32_0 = arith.constant 0 : i32
    return %arg1, %c0_i32 : i32, i32
  }
  func.func @transform_2(%arg0: i32, %arg1: i32) -> (i32, i32) {
    %c0_i32 = arith.constant 0 : i32
    %c0_i32_0 = arith.constant 0 : i32
    %c0_i32_1 = arith.constant 0 : i32
    return %c0_i32, %c0_i32_0 : i32, i32
  }
  func.func @transform_3(%arg0: i32, %arg1: i32) -> (i32, i32) {
    %c0_i32 = arith.constant 0 : i32
    %c0_i32_0 = arith.constant 0 : i32
    %c0_i32_1 = arith.constant 0 : i32
    return %c0_i32, %c0_i32_0 : i32, i32
  }
  func.func @transform_4(%arg0: i32, %arg1: i32) -> (i32, i32) {
    %c0_i32 = arith.constant 0 : i32
    %c0_i32_0 = arith.constant 0 : i32
    return %arg0, %c0_i32 : i32, i32
  }
  func.func @transform_5(%arg0: i32, %arg1: i32) -> (i32, i32) {
    %c0_i32 = arith.constant 0 : i32
    %c0_i32_0 = arith.constant 0 : i32
    return %arg0, %c0_i32 : i32, i32
  }
  func.func @transform_6(%arg0: i32, %arg1: i32) -> (i32, i32) {
    %c0_i32 = arith.constant 0 : i32
    %c0_i32_0 = arith.constant 0 : i32
    return %arg0, %c0_i32 : i32, i32
  }
  func.func @transform_7(%arg0: i32, %arg1: i32) -> (i32, i32) {
    %c0_i32 = arith.constant 0 : i32
    %c0_i32_0 = arith.constant 0 : i32
    return %arg0, %c0_i32 : i32, i32
  }
}

</mosaic_0001>

<bundles_post_ra>
// kernel: tpu_custom_call.1
= control target key start
LH: loop header
LB: loop body
LE: loop exit
PB: predicated region body
PF: predicated region fallthrough
CT: control target
= control target key end

     0   :  { %s2439_s0 = inlined_call_operand.hbm [shape: f32[384,128], index: 0, kind: input, shape index: {}]   ;;  %s2440_s1 = inlined_call_operand.hbm [shape: bf16[128,128], index: 1, kind: input, shape index: {}]   ;;  %s2441_s2 = inlined_call_operand.hbm [shape: f32[1,128], index: 2, kind: input, shape index: {}]   ;;  %s2442_s3 = inlined_call_operand.hbm [shape: f32[1,128], index: 3, kind: input, shape index: {}]   ;;  %s2443_s4 = inlined_call_operand.hbm [shape: f32[384,128], index: 4, kind: output, shape index: {0}]   ;;  %s2444_s5 = inlined_call_operand.hbm [shape: bf16[384,128], index: 5, kind: output, shape index: {1}]   ;;  %s2445_s6 = inlined_call_operand.hbm [shape: f32[384,1], index: 6, kind: output, shape index: {2}]   ;;  %s2446_s7 = inlined_call_operand.hbm [shape: f32[384,1], index: 7, kind: output, shape index: {3}]  }
   0x1   :  { %2454 = sst [smem:[#allocation24_spill]] %s2446_s7 }
   0x2   :  { %13 = vsyncpa [#allocation3], 0 }
   0x3   :  { %15 = vsyncpa [#allocation3 + $0x1], 0 }
   0x4   :  { %16 = vsyncpa [#allocation6], 0 }
   0x5   :  { %17 = vsyncpa [#allocation9], 0 }
   0x6   :  { %18 = vsyncpa [#allocation4], 0 }
   0x7   :  { %20 = vsyncpa [#allocation4 + $0x1], 0 }
   0x8   :  { %21 = vsyncpa [#allocation12], 0 }
   0x9   :  { %23 = vsyncpa [#allocation12 + $0x1], 0 }
   0xa   :  { %24 = vsyncpa [#allocation15], 0 }
   0xb   :  { %26 = vsyncpa [#allocation15 + $0x1], 0  ;;  %s1844_s24 = smov 0   ;;  %s1846_s25 = smov 0  }
   0xc   :  { %s1848_s26 = smov 0   ;;  %s1850_s27 = smov 0  }
   0xd   :  { %s1852_s28 = smov 0   ;;  %s1854_s29 = smov 0  }
   0xe LB: > { %2455 = sst [smem:[#allocation22_spill]] %s1766_s24  ;;  %s1875_s30 = sadd.s32 4294967295, %s1786_s29   ;;  %s1786_s29 = sphi %s1854_s29, %s32_s29   ;;  %s1782_s28 = sphi %s1852_s28, %s2480_s28   ;;  %s1778_s27 = sphi %s1850_s27, %s2479_s27   ;;  %s1774_s26 = sphi %s1848_s26, %s2478_s26   ;;  %s1770_s25 = sphi %s1846_s25, %s2477_s25   ;;  %s1766_s24 = sphi %s1844_s24, %s2476_s24  }
   0xf   : > { %s2448_s8 = sadd.s32 4294967294, %s1786_s29   ;;  %p66_p0 = scmp.ne.s32.totalorder %s1770_s25, %s1766_s24 }
  0x10   : > { %p2447_p1 = scmp.eq.s32.totalorder %s1875_s30, 0  ;;  %p164_p3 = scmp.eq.s32.totalorder %s2448_s8, 2 }
  0x11   : > { %p1176_p5 = scmp.ge.s32.totalorder %s1786_s29, 1  ;;  %p249_p7 = scmp.lt.s32.totalorder %s1786_s29, 4 }
  0x12   : > { %p1886_p4 = por %p2447_p1, %p66_p0  ;;  %p1891_p6 = por %p164_p3, %p66_p0 }
  0x13   : > { %p1896_p8 = pnand %p1176_p5, %p249_p7  ;;  %s1788_s12 = smov [#allocation5]  }
  0x14   : > { %s2456_s9 = scalar_select %p1886_p4, 1, 0 }
  0x15   : > { %s2457_s10 = scalar_select %p1891_p6, 1, 0 }
  0x16   : > { %s2459_s11 = scalar_select %p1896_p8, 1, 0 }
  0x17   : > { %2458 = sst [smem:[#allocation23_spill]] %s2457_s10  ;;  %s264_s13 = sshll.u32 %s1788_s12, 4  ;;  %s1900_s13 = int_to_ptr.vmem [resolvable:$true] %s264_s13 }
  0x18   : > { %p1387_p9 = pneg %p1896_p8  ;;  %s1789_s15 = smov [#allocation7]  }
  0x19   : > { %s278_s16 = sshll.u32 %s1789_s15, 4  ;;  %s1790_s17 = smov [#allocation8]   ;;  %s1910_s16 = int_to_ptr.vmem [resolvable:$true] %s278_s16 }
  0x1a   : > { %p1906_p10 = pnand %p1387_p9, %p2447_p1  ;;  %s1912_s18 = sshll.u32 %s1790_s17, 4  ;;  %s290_s18 = int_to_ptr.vmem [resolvable:$true] %s1912_s18 }
  0x1b   : > { %s1490_s21 = scalar_lea.hbm %s2440_s1, 1024 }
  0x1c   : > { %p1491_p11 = scmp.ne.s32.totalorder %s2440_s1, %s1490_s21  ;;  %p1922_p12 = pneg %p1906_p10 }
  0x1d   : > { %p1497_p3 = scmp.lt.u32.totalorder %s1490_s21, %s2440_s1 }
  0x1e   : > { %p1493_p13 = pnand %p1922_p12, %p1491_p11 }
  0x20   : > { %p1494_p0 = pneg %p1493_p13 }
  0x22   : > { %p1499_p5 = pnand %p1497_p3, %p1494_p0 }
  0x24   : > { %1502 = shalt.err (!%p1499_p5)
}
  0x25   : > { %s1503_s19 = scalar_lea.vmem %s1900_s13, 1024  ;;  %p1511_p2 = scmp.lt.s32.totalorder %s1900_s13, %s1900_s13 }
  0x26   : > { %p1504_p7 = scmp.ne.s32.totalorder %s1900_s13, %s1503_s19  ;;  %p1512_p6 = scmp.lt.s32.totalorder %s1503_s19, %s1503_s19 }
  0x28   : > { %p1506_p9 = pnand %p1504_p7, %p1922_p12  ;;  %p1513_p11 = por %p1512_p6, %p1511_p2 }
  0x2a   : > { %p1507_p1 = pneg %p1506_p9 }
  0x2c   : > { %p1514_p13 = pnand %p1513_p11, %p1507_p1 }
  0x2e   : > { %1517 = shalt.err (!%p1514_p13)
}
  0x2f   : > { %s1791_s20 = smov 64   ;;  %s1792_s21 = smov 4  }
  0x30   : > { %1390 = dma.hbm_to_vmem [thread:$0]  (!%p1906_p10), %s2440_s1, 1024, %s1900_s13, [#allocation6], %s1791_s20, %s1791_s20, %s1792_s21  }
  0x31   : > { %s1518_s8 = scalar_lea.hbm %s2441_s2, 16 }
  0x32   : > { %p1519_p2 = scmp.ne.s32.totalorder %s2441_s2, %s1518_s8  ;;  %p1525_p0 = scmp.lt.u32.totalorder %s1518_s8, %s2441_s2 }
  0x34   : > { %p1521_p1 = pnand %p1519_p2, %p1922_p12 }
  0x36   : > { %p1522_p6 = pneg %p1521_p1 }
  0x38   : > { %p1527_p3 = pnand %p1525_p0, %p1522_p6 }
  0x3a   : > { %1530 = shalt.err (!%p1527_p3)
}
  0x3b   : > { %s1531_s13 = scalar_lea.vmem %s1910_s16, 16  ;;  %s1538_s24 = scalar_lea.vmem %s1910_s16, 32 }
  0x3c   : > { %p1532_p5 = scmp.ne.s32.totalorder %s1910_s16, %s1531_s13  ;;  %p1539_p11 = scmp.lt.s32.totalorder %s1910_s16, %s1910_s16 }
  0x3d   : > { %p1540_p13 = scmp.lt.s32.totalorder %s1538_s24, %s1531_s13 }
  0x3e   : > { %p1534_p7 = pnand %p1532_p5, %p1922_p12 }
  0x3f   : > { %p1541_p2 = por %p1540_p13, %p1539_p11 }
  0x40   : > { %p1535_p9 = pneg %p1534_p7 }
  0x42   : > { %p1542_p1 = pnand %p1541_p2, %p1535_p9 }
  0x44   : > { %1545 = shalt.err (!%p1542_p1)
}
  0x45   : > { %1393 = dma.hbm_to_vmem [thread:$0]  (!%p1906_p10), %s2441_s2, 16, %s1910_s16, [#allocation6]  }
  0x46   : > { %s1546_s21 = scalar_lea.hbm %s2442_s3, 16 }
  0x47   : > { %p1547_p6 = scmp.ne.s32.totalorder %s2442_s3, %s1546_s21  ;;  %p1553_p5 = scmp.lt.u32.totalorder %s1546_s21, %s2442_s3 }
  0x49   : > { %p1549_p0 = pnand %p1547_p6, %p1922_p12 }
  0x4b   : > { %p1550_p3 = pneg %p1549_p0 }
  0x4d   : > { %p1555_p7 = pnand %p1553_p5, %p1550_p3 }
  0x4f   : > { %1558 = shalt.err (!%p1555_p7)
}
  0x50   : > { %s1559_s19 = scalar_lea.vmem %s290_s18, 16  ;;  %s1566_s16 = scalar_lea.vmem %s290_s18, 32 }
  0x51   : > { %p1560_p9 = scmp.ne.s32.totalorder %s290_s18, %s1559_s19  ;;  %p1567_p2 = scmp.lt.s32.totalorder %s290_s18, %s290_s18 }
  0x52   : > { %p1568_p1 = scmp.lt.s32.totalorder %s1566_s16, %s1559_s19 }
  0x53   : > { %p1562_p11 = pnand %p1560_p9, %p1922_p12 }
  0x54   : > { %p1569_p4 = por %p1568_p1, %p1567_p2 }
  0x55   : > { %p1563_p13 = pneg %p1562_p11 }
  0x57   : > { %p1570_p8 = pnand %p1569_p4, %p1563_p13 }
  0x59   : > { %1573 = shalt.err (!%p1570_p8)
}
  0x5a   : > { %1396 = dma.hbm_to_vmem [thread:$0]  (!%p1906_p10), %s2442_s3, 16, %s290_s18, [#allocation9]  }
  0x5b   : > { %s53_s12 = sadd.s32 1, %s1774_s26  ;;  %s44_s7 = sadd.s32 1, %s1782_s28 }
  0x5c   : > { %p60_p4 = scmp.ne.s32.totalorder %s1774_s26, %s1770_s25  ;;  %p46_p8 = scmp.ge.s32.totalorder %s44_s7, 3 }
  0x5d   : > { %p61_p12 = scmp.eq.s32.totalorder %s1786_s29, 0  ;;  %p2462_p6 = scmp.eq.s32.totalorder %s1875_s30, 2 }
  0x5e   : > { %p1417_p3 = scmp.lt.s32.totalorder %s1786_s29, 3  ;;  %s2482_s7 = smov (%p46_p8, %s44_s7), 0 }
  0x5f   : > { %p1993_p0 = por %p2462_p6, %p60_p4  ;;  %p62_p5 = por %p61_p12, %p60_p4 }
  0x60   : > { %s300_s8 = sand.u32 1, %s1774_s26   ;;  %s48_s10 = ssub.s32 %s1782_s28, %s2482_s7 }
  0x61   : > { %p51_p7 = scmp.eq.s32.totalorder %s48_s10, 0  ;;  %s1181_s18 = sshll.u32 %s300_s8, 7 }
  0x62   : > { %s1233_s20 = sshll.u32 %s1782_s28, 11  ;;  %s304_s17 = scalar_lea.vmem [#allocation2], %s1181_s18 }
  0x63   : > { %s2005_s21 = scalar_select %p51_p7, %s1774_s26, %s53_s12  }
  0x64   : > { %s2010_s15 = scalar_lea.hbm %s2439_s0, %s1233_s20  ;;  %s312_s19 = sshll.u32 %s304_s17, 4  ;;  %s2012_s19 = int_to_ptr.vmem [resolvable:$true] %s312_s19 }
  0x65   : > { %p2016_p10 = pnand %p1417_p3, %p62_p5  ;;  %s2020_s13 = scalar_lea.sflag [#allocation3], %s300_s8 }
  0x66   : > { %s1574_s24 = scalar_lea.hbm %s2010_s15, 2048  ;;  %s1579_s18 = scalar_lea.hbm %s2439_s0, 6144 }
  0x67   : > { %p1575_p9 = scmp.ne.s32.totalorder %s2010_s15, %s1574_s24  ;;  %p1576_p11 = pneg %p2016_p10 }
  0x68   : > { %p1580_p1 = scmp.lt.u32.totalorder %s2010_s15, %s2439_s0  ;;  %p1581_p4 = scmp.lt.u32.totalorder %s1579_s18, %s1574_s24 }
  0x69   : > { %p1577_p13 = pnand %p1576_p11, %p1575_p9  ;;  %p1583_p12 = scmp.lt.u32.totalorder %s1574_s24, %s2010_s15 }
  0x6a   : > { %p1582_p8 = por %p1581_p4, %p1580_p1 }
  0x6b   : > { %p1578_p2 = pneg %p1577_p13 }
  0x6c   : > { %p1584_p6 = por %p1583_p12, %p1582_p8 }
  0x6e   : > { %p1585_p3 = pnand %p1584_p6, %p1578_p2 }
  0x70   : > { %1588 = shalt.err (!%p1585_p3)
}
  0x71   : > { %s1589_s8 = scalar_lea.vmem %s2012_s19, 2048  ;;  %s1793_s23 = smov [#allocation2]  }
  0x72   : > { %p1590_p5 = scmp.ne.s32.totalorder %s2012_s19, %s1589_s8  ;;  %s1594_s17 = sshll.u32 %s1793_s23, 4  ;;  %s1595_s17 = int_to_ptr.vmem [resolvable:$false] %s1594_s17 }
  0x73   : > { %s1596_s12 = scalar_lea.vmem %s1595_s17, 4096  ;;  %p1597_p13 = scmp.lt.s32.totalorder %s2012_s19, %s1595_s17 }
  0x74   : > { %p1592_p7 = pnand %p1590_p5, %p1576_p11  ;;  %p1598_p1 = scmp.lt.s32.totalorder %s1596_s12, %s1589_s8 }
  0x76   : > { %p1593_p9 = pneg %p1592_p7  ;;  %p1599_p4 = por %p1598_p1, %p1597_p13 }
  0x78   : > { %p1600_p8 = pnand %p1599_p4, %p1593_p9 }
  0x7a   : > { %1603 = shalt.err (!%p1600_p8)
}
  0x7b   : > { %s1794_s24 = smov 128   ;;  %s1795_s10 = smov 8  }
  0x7c   : > { %1400 = dma.hbm_to_vmem [thread:$0]  (!%p2016_p10), %s2010_s15, 2048, %s2012_s19, %s2020_s13, %s1794_s24, %s1794_s24, %s1795_s10  }
  0x7d   : > { %p2465_p11 = scmp.ne.s32.totalorder %s2459_s11, 0 }
  0x7e   : > { %s2051_s18 = sand.u32 (!%p2465_p11), 1, %s1770_s25   ;;  %p2466_p2 = scmp.ne.s32.totalorder (!%p2465_p11), %s2456_s9, 0 }
  0x7f   : > { %324 = sbr.rel (%p2465_p11) target bundleno = 620 (0x26c), region = 36  ;;  %s2054_s20 = sshll.u32 (!%p2465_p11), %s2051_s18, 7 }
  0x80   : > { %s327_s22 = scalar_lea.sflag (!%p2465_p11), [#allocation3], %s2051_s18  ;;  %s2058_s8 = scalar_lea.vmem (!%p2465_p11), [#allocation2], %s2054_s20 }
  0x86   : > { %1741 = dma.done.wait (%p2466_p2), %s327_s22, 2048  }
  0x87   : > { %1743 = vsyncadd (%p2466_p2), %s327_s22, 4294965248  ;;  %p2467_p10 = scmp.eq.s32.totalorder %s1875_s30, 0 }
  0x89   : > { %1745 = dma.done.wait (%p2467_p10), [#allocation6], 1040   ;;  %p2468_p12 = pmov %p2467_p10 }
  0x8a   : > { %p2469_p6 = pmov %p2467_p10 }
  0x8b   : > { %1747 = vsyncadd (%p2468_p12), [#allocation6], 4294966256 }
  0x8c   : > { %1749 = dma.done.wait (%p2469_p6), [#allocation9], 16   ;;  %p2470_p3 = pmov %p2469_p6 }
  0x8d   : > { %v1482_v0 = vld [vmem:[#allocation5] sm:$0xff]   ;;  %v1483_v1 = vld [vmem:[#allocation5 + $0x8] sm:$0xff]   ;;  %v1484_v2 = vld [vmem:[#allocation5 + $0x10] sm:$0xff]   ;;  %s1190_s9 = sshll.u32 %s2051_s18, 6  ;;  %s2096_s11 = scalar_lea.vmem [#allocation10], %s2054_s20 }
  0x8e   : > { %1751 = vsyncadd (%p2470_p3), [#allocation9], 4294967280  ;;  %1317 = vmatprep.subr.bf16.mxu0 %v1482_v0  ;;  %1349 = vmatprep.subr.bf16.mxu1 %v1482_v0  ;;  %v1485_v3 = vld [vmem:[#allocation5 + $0x18] sm:$0xff]   ;;  %v431_v4 = vld [vmem:[%s2058_s8] sm:$0xff]  ;;  %s2120_s15 = scalar_lea.vmem [#allocation11], %s1190_s9  ;;  %s895_s19 = sand.u32 1, %s1875_s30  }
  0x8f   : > { %1318 = vmatpush3.bf16.msra.mxu0 %v1482_v0  ;;  %1357 = vmatpush3.bf16.msra.mxu1 %v1482_v0  ;;  %v432_v5 = vld [vmem:[%s2058_s8 + $0x8] sm:$0xff]  ;;  %v439_v6 = vld [vmem:[%s2058_s8 + $0x40] sm:$0xff]  ;;  %v1488_v12 = vld [vmem:[#allocation5 + $0x30] sm:$0xff]   ;;  %s1251_s16 = sshll.u32 %s1778_s27, 10  ;;  %s935_s12 = sshll.u32 %s2120_s15, 4  ;;  %s2210_s12 = int_to_ptr.vmem [resolvable:$true] %s935_s12 }
  0x90   : > { %1319 = vmatprep.subr.bf16.mxu0 %v1483_v1  ;;  %1350 = vmatprep.subr.bf16.mxu1 %v1483_v1  ;;  %v447_v7 = vpack.c.bf16 %v432_v5, %v431_v4  ;;  %v440_v8 = vld [vmem:[%s2058_s8 + $0x48] sm:$0xff]  ;;  %v1486_v10 = vld [vmem:[#allocation5 + $0x20] sm:$0xff]   ;;  %v1489_v13 = vld [vmem:[#allocation5 + $0x38] sm:$0xff]   ;;  %s2207_s17 = scalar_lea.hbm %s2444_s5, %s1251_s16  ;;  %s2212_s24 = scalar_lea.sflag [#allocation12], %s895_s19 }
  0x91   : > { %v451_v9 = vpack.c.bf16 %v440_v8, %v439_v6  ;;  %v1487_v11 = vld [vmem:[#allocation5 + $0x28] sm:$0xff]   ;;  %v433_v14 = vld [vmem:[%s2058_s8 + $0x10] sm:$0xff]  ;;  %v434_v15 = vld [vmem:[%s2058_s8 + $0x18] sm:$0xff]  ;;  %s1604_s10 = scalar_lea.vmem %s2210_s12, 1024  ;;  %s1796_s30 = smov [#allocation11]  }
  0x92   : > { %1333 = vmatprep.mubr.bf16.mxu0 %v447_v7  ;;  %v441_v16 = vld [vmem:[%s2058_s8 + $0x50] sm:$0xff]  ;;  %v442_v17 = vld [vmem:[%s2058_s8 + $0x58] sm:$0xff]  ;;  %v435_v18 = vld [vmem:[%s2058_s8 + $0x20] sm:$0xff]  ;;  %v448_v22 = vpack.c.bf16 %v434_v15, %v433_v14  ;;  %p1605_p5 = scmp.ne.s32.totalorder %s2210_s12, %s1604_s10  ;;  %s1608_s22 = sshll.u32 %s1796_s30, 4  ;;  %s1609_s22 = int_to_ptr.vmem [resolvable:$false] %s1608_s22 }
  0x93   : > { %1320 = vmatpush3.bf16.msra.mxu0 %v1483_v1  ;;  %1358 = vmatpush3.bf16.msra.mxu1 %v1483_v1  ;;  %v436_v19 = vld [vmem:[%s2058_s8 + $0x28] sm:$0xff]  ;;  %v443_v20 = vld [vmem:[%s2058_s8 + $0x60] sm:$0xff]  ;;  %v452_v23 = vpack.c.bf16 %v442_v17, %v441_v16  ;;  %v437_v26 = vld [vmem:[%s2058_s8 + $0x30] sm:$0xff]  ;;  %p1611_p13 = scmp.lt.s32.totalorder %s2210_s12, %s1609_s22 }
  0x94   : > { %1321 = vmatprep.subr.bf16.mxu0 %v1484_v2  ;;  %1351 = vmatprep.subr.bf16.mxu1 %v1484_v2  ;;  %v444_v21 = vld [vmem:[%s2058_s8 + $0x68] sm:$0xff]  ;;  %v449_v24 = vpack.c.bf16 %v436_v19, %v435_v18  ;;  %v438_v27 = vld [vmem:[%s2058_s8 + $0x38] sm:$0xff]  ;;  %v445_v28 = vld [vmem:[%s2058_s8 + $0x70] sm:$0xff]  ;;  %p1606_p7 = pnand %p1605_p5, %p1993_p0 }
  0x95   : > { %1341 = vmatprep.mubr.bf16.mxu1 %v451_v9  ;;  %v453_v25 = vpack.c.bf16 %v444_v21, %v443_v20  ;;  %v446_v29 = vld [vmem:[%s2058_s8 + $0x78] sm:$0xff]  ;;  %v450_v30 = vpack.c.bf16 %v438_v27, %v437_v26  ;;  %v2088_v34 = vld [vmem:[#allocation7] ss:$0 sm:$0xff]  ;;  %v2110_v43 = vld [vmem:[#allocation8] ss:$0 sm:$0xff]  ;;  %s1610_s8 = scalar_lea.vmem %s1609_s22, 2048 }
  0x96   : > { %v454_v31 = vpack.c.bf16 %v446_v29, %v445_v28  ;;  %p1607_p9 = pneg %p1606_p7  ;;  %p1612_p1 = scmp.lt.s32.totalorder %s1610_s8, %s1604_s10 }
  0x97   : > { %1322 = vmatpush3.bf16.msra.mxu0 %v1484_v2  ;;  %1359 = vmatpush3.bf16.msra.mxu1 %v1484_v2 }
  0x98   : > { %1323 = vmatprep.subr.bf16.mxu0 %v1485_v3  ;;  %1352 = vmatprep.subr.bf16.mxu1 %v1485_v3  ;;  %p1613_p4 = por %p1612_p1, %p1611_p13 }
  0x9a   : > { %p1614_p8 = pnand %p1613_p4, %p1607_p9 }
  0x9b   : > { %1324 = vmatpush3.bf16.msra.mxu0 %v1485_v3  ;;  %1360 = vmatpush3.bf16.msra.mxu1 %v1485_v3 }
  0x9c   : > { %1325 = vmatprep.subr.bf16.mxu0 %v1486_v10  ;;  %1353 = vmatprep.subr.bf16.mxu1 %v1486_v10 }
  0x9f   : > { %1326 = vmatpush3.bf16.msra.mxu0 %v1486_v10  ;;  %1361 = vmatpush3.bf16.msra.mxu1 %v1486_v10 }
  0xa0   : > { %1327 = vmatprep.subr.bf16.mxu0 %v1487_v11  ;;  %1354 = vmatprep.subr.bf16.mxu1 %v1487_v11 }
  0xa3   : > { %1328 = vmatpush3.bf16.msra.mxu0 %v1487_v11  ;;  %1362 = vmatpush3.bf16.msra.mxu1 %v1487_v11 }
  0xa4   : > { %1329 = vmatprep.subr.bf16.mxu0 %v1488_v12  ;;  %1355 = vmatprep.subr.bf16.mxu1 %v1488_v12 }
  0xa7   : > { %1330 = vmatpush3.bf16.msra.mxu0 %v1488_v12  ;;  %1363 = vmatpush3.bf16.msra.mxu1 %v1488_v12 }
  0xa8   : > { %1331 = vmatprep.subr.bf16.mxu0 %v1489_v13  ;;  %1356 = vmatprep.subr.bf16.mxu1 %v1489_v13 }
  0xab   : > { %1332 = vmatpush3.bf16.msra.mxu0 %v1489_v13  ;;  %1364 = vmatpush3.bf16.msra.mxu1 %v1489_v13 }
  0xae   : > { %1334 = vmatmul.mubr.bf16.vlgmr.msra.gmra.mrb[0].mxu0 %v448_v22  ;;  %1342 = vmatmul.mubr.bf16.vlgmr.msra.gmra.mrb[0].mxu1 %v452_v23 }
  0xaf   : > { %1337 = vmatprep.mubr.bf16.mxu0 %v449_v24  ;;  %1345 = vmatprep.mubr.bf16.mxu1 %v453_v25 }
  0xb6   : > { %1338 = vmatmul.mubr.bf16.gmra.mrb[4].mxu0 %v450_v30  ;;  %1346 = vmatmul.mubr.bf16.gmra.mrb[4].mxu1 %v454_v31 }
 0x181   : > { %v1335_v32 = vpop.f32.mrb[0].mxu0  ;;  %v1343_v33 = vpop.f32.mrb[0].mxu1 }
 0x182   : > { %v2090_v35 = vpop.f32.mrb[1].mxu0  ;;  %v2092_v36 = vpop.f32.mrb[1].mxu1  ;;  %634 = vst [vmem:[%s2096_s11 + $0x10] sm:$0xff] %v1335_v32  ;;  %642 = vst [vmem:[%s2096_s11 + $0x50] sm:$0xff] %v1343_v33  ;;  %v764_v41 = vmul.f32 %v1343_v33, %v2088_v34  ;;  %v756_v42 = vmul.f32 %v1335_v32, %v2088_v34  ;;  %v828_v46 = vmul.f32 %v1335_v32, %v2110_v43 }
 0x183   : > { %v1336_v37 = vpop.f32.mrb[2].mxu0  ;;  %v1344_v38 = vpop.f32.mrb[2].mxu1  ;;  %632 = vst [vmem:[%s2096_s11] sm:$0xff] %v2090_v35  ;;  %640 = vst [vmem:[%s2096_s11 + $0x40] sm:$0xff] %v2092_v36  ;;  %v836_v56 = vmul.f32 %v1343_v33, %v2110_v43  ;;  %v754_v0 = vmul.f32 %v2088_v34, %v2090_v35  ;;  %v762_v3 = vmul.f32 %v2088_v34, %v2092_v36 }
 0x184   : > { %v2100_v39 = vpop.f32.mrb[3].mxu0  ;;  %v2102_v40 = vpop.f32.mrb[3].mxu1  ;;  %635 = vst [vmem:[%s2096_s11 + $0x18] sm:$0xff] %v1336_v37  ;;  %643 = vst [vmem:[%s2096_s11 + $0x58] sm:$0xff] %v1344_v38  ;;  %790 = vadd.xlane.f32.xlu0 %v764_v41  ;;  %774 = vadd.xlane.f32.xlu1 %v756_v42  ;;  %v1262_v44 = vpack.c.bf16 %v1336_v37, %v1335_v32  ;;  %v1282_v45 = vpack.c.bf16 %v1344_v38, %v1343_v33 }
 0x185   : > { %633 = vst [vmem:[%s2096_s11 + $0x8] sm:$0xff] %v2100_v39  ;;  %641 = vst [vmem:[%s2096_s11 + $0x48] sm:$0xff] %v2102_v40  ;;  %v757_v47 = vmul.f32 %v1336_v37, %v2088_v34  ;;  %v1277_v48 = vpack.c.bf16 %v2102_v40, %v2092_v36  ;;  %v1257_v51 = vpack.c.bf16 %v2100_v39, %v2090_v35 }
 0x186   : > { %1294 = vst [vmem:[%s2120_s15 + $0x8] sm:$0xff] %v1262_v44   ;;  %1298 = vst [vmem:[%s2120_s15 + $0x28] sm:$0xff] %v1282_v45   ;;  %v765_v57 = vmul.f32 %v1344_v38, %v2088_v34  ;;  %v829_v63 = vmul.f32 %v1336_v37, %v2110_v43  ;;  %v837_v2 = vmul.f32 %v1344_v38, %v2110_v43 }
 0x187   : > { %1297 = vst [vmem:[%s2120_s15 + $0x20] sm:$0xff] %v1277_v48   ;;  %1258 = vst [vmem:[%s2120_s15] sm:$0xff] %v1257_v51   ;;  %v763_v4 = vmul.f32 %v2088_v34, %v2102_v40  ;;  %v826_v5 = vmul.f32 %v2110_v43, %v2090_v35  ;;  %v827_v6 = vmul.f32 %v2110_v43, %v2100_v39 }
 0x188   : > { %846 = vadd.xlane.f32.xlu0 %v828_v46  ;;  %776 = vadd.xlane.f32.xlu1 %v757_v47  ;;  %v834_v7 = vmul.f32 %v2110_v43, %v2092_v36  ;;  %v835_v8 = vmul.f32 %v2110_v43, %v2102_v40  ;;  %v755_v9 = vmul.f32 %v2088_v34, %v2100_v39 }
 0x189   : > { %v1339_v49 = vpop.f32.mrb[4].mxu0  ;;  %v2126_v50 = vpop.f32.mrb[4].mxu1 }
 0x18a   : > { %v2130_v52 = vpop.f32.mrb[5].mxu0  ;;  %v2132_v53 = vpop.f32.mrb[5].mxu1  ;;  %638 = vst [vmem:[%s2096_s11 + $0x30] sm:$0xff] %v1339_v49  ;;  %646 = vst [vmem:[%s2096_s11 + $0x70] sm:$0xff] %v2126_v50  ;;  %v760_v11 = vmul.f32 %v1339_v49, %v2088_v34  ;;  %v768_v13 = vmul.f32 %v2126_v50, %v2088_v34  ;;  %v832_v15 = vmul.f32 %v1339_v49, %v2110_v43 }
 0x18b   : > { %v1340_v54 = vpop.f32.mrb[6].mxu0  ;;  %v2135_v55 = vpop.f32.mrb[6].mxu1  ;;  %636 = vst [vmem:[%s2096_s11 + $0x20] sm:$0xff] %v2130_v52  ;;  %644 = vst [vmem:[%s2096_s11 + $0x60] sm:$0xff] %v2132_v53  ;;  %v758_v17 = vmul.f32 %v2088_v34, %v2130_v52  ;;  %v766_v19 = vmul.f32 %v2088_v34, %v2132_v53  ;;  %v830_v21 = vmul.f32 %v2110_v43, %v2130_v52 }
 0x18c   : > { %v572_v58 = vpop.f32.mrb[7].mxu0  ;;  %v604_v59 = vpop.f32.mrb[7].mxu1  ;;  %862 = vadd.xlane.f32.xlu0 %v836_v56  ;;  %792 = vadd.xlane.f32.xlu1 %v765_v57  ;;  %639 = vst [vmem:[%s2096_s11 + $0x38] sm:$0xff] %v1340_v54  ;;  %647 = vst [vmem:[%s2096_s11 + $0x78] sm:$0xff] %v2135_v55  ;;  %v1272_v60 = vpack.c.bf16 %v1340_v54, %v1339_v49  ;;  %v1292_v61 = vpack.c.bf16 %v2135_v55, %v2126_v50 }
 0x18d   : > { %637 = vst [vmem:[%s2096_s11 + $0x28] sm:$0xff] %v572_v58  ;;  %645 = vst [vmem:[%s2096_s11 + $0x68] sm:$0xff] %v604_v59  ;;  %v1267_v62 = vpack.c.bf16 %v572_v58, %v2130_v52  ;;  %v1287_v1 = vpack.c.bf16 %v604_v59, %v2132_v53  ;;  %v761_v10 = vmul.f32 %v1340_v54, %v2088_v34 }
 0x18e   : > { %1296 = vst [vmem:[%s2120_s15 + $0x18] sm:$0xff] %v1272_v60   ;;  %1300 = vst [vmem:[%s2120_s15 + $0x38] sm:$0xff] %v1292_v61   ;;  %v769_v12 = vmul.f32 %v2135_v55, %v2088_v34  ;;  %v833_v14 = vmul.f32 %v1340_v54, %v2110_v43  ;;  %v759_v16 = vmul.f32 %v2088_v34, %v572_v58 }
 0x18f   : > { %1295 = vst [vmem:[%s2120_s15 + $0x10] sm:$0xff] %v1267_v62   ;;  %1299 = vst [vmem:[%s2120_s15 + $0x30] sm:$0xff] %v1287_v1   ;;  %v767_v18 = vmul.f32 %v2088_v34, %v604_v59  ;;  %v831_v20 = vmul.f32 %v2110_v43, %v572_v58  ;;  %v839_v22 = vmul.f32 %v2110_v43, %v604_v59 }
 0x190   : > { %848 = vadd.xlane.f32.xlu1 %v829_v63  ;;  %770 = vadd.xlane.f32.xlu0 %v754_v0  ;;  %v838_v23 = vmul.f32 %v2110_v43, %v2132_v53  ;;  %v841_v24 = vmul.f32 %v2135_v55, %v2110_v43  ;;  %v840_v25 = vmul.f32 %v2126_v50, %v2110_v43 }
 0x194   : > { %864 = vadd.xlane.f32.xlu1 %v837_v2  ;;  %786 = vadd.xlane.f32.xlu0 %v762_v3 }
 0x198   : > { %788 = vadd.xlane.f32.xlu1 %v763_v4  ;;  %842 = vadd.xlane.f32.xlu0 %v826_v5 }
 0x19c   : > { %844 = vadd.xlane.f32.xlu1 %v827_v6  ;;  %858 = vadd.xlane.f32.xlu0 %v834_v7 }
 0x1a0   : > { %860 = vadd.xlane.f32.xlu1 %v835_v8  ;;  %772 = vadd.xlane.f32.xlu0 %v755_v9 }
 0x1a4   : > { %784 = vadd.xlane.f32.xlu1 %v761_v10  ;;  %782 = vadd.xlane.f32.xlu0 %v760_v11 }
 0x1a8   : > { %800 = vadd.xlane.f32.xlu1 %v769_v12  ;;  %798 = vadd.xlane.f32.xlu0 %v768_v13 }
 0x1ac   : > { %856 = vadd.xlane.f32.xlu1 %v833_v14  ;;  %854 = vadd.xlane.f32.xlu0 %v832_v15 }
 0x1b0   : > { %780 = vadd.xlane.f32.xlu1 %v759_v16  ;;  %778 = vadd.xlane.f32.xlu0 %v758_v17 }
 0x1b4   : > { %796 = vadd.xlane.f32.xlu1 %v767_v18  ;;  %794 = vadd.xlane.f32.xlu0 %v766_v19 }
 0x1b8   : > { %852 = vadd.xlane.f32.xlu1 %v831_v20  ;;  %850 = vadd.xlane.f32.xlu0 %v830_v21 }
 0x1bc   : > { %868 = vadd.xlane.f32.xlu1 %v839_v22  ;;  %866 = vadd.xlane.f32.xlu0 %v838_v23 }
 0x1c0   : > { %872 = vadd.xlane.f32.xlu1 %v841_v24  ;;  %870 = vadd.xlane.f32.xlu0 %v840_v25 }
 0x1c1   : > { %1617 = shalt.err (!%p1614_p8)
}
 0x1c2   : > { %s1618_s9 = scalar_lea.hbm %s2207_s17, 1024  ;;  %s1622_s16 = scalar_lea.hbm %s2444_s5, 3072 }
 0x1c3   : > { %p1619_p11 = scmp.ne.s32.totalorder %s2207_s17, %s1618_s9  ;;  %p1623_p12 = scmp.lt.u32.totalorder %s2207_s17, %s2444_s5 }
 0x1c4   : > { %p1624_p6 = scmp.lt.u32.totalorder %s1622_s16, %s1618_s9  ;;  %p1626_p5 = scmp.lt.u32.totalorder %s1618_s9, %s2207_s17 }
 0x1c5   : > { %p1620_p2 = pnand %p1619_p11, %p1993_p0 }
 0x1c6   : > { %p1625_p3 = por %p1624_p6, %p1623_p12 }
 0x1c7   : > { %p1621_p10 = pneg %p1620_p2 }
 0x1c8   : > { %p1627_p7 = por %p1626_p5, %p1625_p3 }
 0x1ca   : > { %p1628_p9 = pnand %p1627_p7, %p1621_p10 }
 0x1cc   : > { %1631 = shalt.err (!%p1628_p9)
}
 0x1cd   : > { %s1797_s10 = smov 64   ;;  %s1798_s30 = smov 4  }
 0x1ce   : > { %1380 = dma.vmem_to_hbm [thread:$0]  (%p1993_p0), %s2210_s12, 1024, %s2207_s17, %s2212_s24, %s1797_s10, %s1797_s10, %s1798_s30  }
 0x1cf   : > { %s2237_s22 = sshll.u32 %s1778_s27, 11  ;;  %s919_s19 = sshll.u32 %s2096_s11, 4  ;;  %s2246_s19 = int_to_ptr.vmem [resolvable:$true] %s919_s19 }
 0x1d0   : > { %s2243_s15 = scalar_lea.hbm %s2443_s4, %s2237_s22  ;;  %s891_s16 = scalar_lea.sflag [#allocation4], %s2051_s18 }
 0x1d1   : > { %s1632_s13 = scalar_lea.vmem %s2246_s19, 2048  ;;  %s1799_s27 = smov [#allocation10]  }
 0x1d2   : > { %p1633_p13 = scmp.ne.s32.totalorder %s2246_s19, %s1632_s13  ;;  %s1636_s17 = sshll.u32 %s1799_s27, 4  ;;  %s1637_s17 = int_to_ptr.vmem [resolvable:$false] %s1636_s17 }
 0x1d3   : > { %s1638_s12 = scalar_lea.vmem %s1637_s17, 4096  ;;  %p1639_p8 = scmp.lt.s32.totalorder %s2246_s19, %s1637_s17 }
 0x1d4   : > { %p1634_p1 = pnand %p1633_p13, %p1993_p0  ;;  %p1640_p11 = scmp.lt.s32.totalorder %s1638_s12, %s1632_s13 }
 0x1d6   : > { %p1635_p4 = pneg %p1634_p1  ;;  %p1641_p2 = por %p1640_p11, %p1639_p8 }
 0x1d8   : > { %p1642_p10 = pnand %p1641_p2, %p1635_p4 }
 0x1da   : > { %1645 = shalt.err (!%p1642_p10)
}
 0x1db   : > { %s1646_s11 = scalar_lea.hbm %s2243_s15, 2048  ;;  %s1650_s30 = scalar_lea.hbm %s2443_s4, 6144 }
 0x1dc   : > { %p1647_p12 = scmp.ne.s32.totalorder %s2243_s15, %s1646_s11  ;;  %p1651_p5 = scmp.lt.u32.totalorder %s2243_s15, %s2443_s4 }
 0x1dd   : > { %p1652_p7 = scmp.lt.u32.totalorder %s1650_s30, %s1646_s11  ;;  %p1654_p13 = scmp.lt.u32.totalorder %s1646_s11, %s2243_s15 }
 0x1de   : > { %p1648_p6 = pnand %p1647_p12, %p1993_p0 }
 0x1df   : > { %p1653_p9 = por %p1652_p7, %p1651_p5 }
 0x1e0   : > { %p1649_p3 = pneg %p1648_p6 }
 0x1e1   : > { %p1655_p1 = por %p1654_p13, %p1653_p9 }
 0x1e3   : > { %p1656_p4 = pnand %p1655_p1, %p1649_p3 }
 0x1e5   : > { %1659 = shalt.err (!%p1656_p4)
}
 0x1e6   : > { %s1800_s13 = smov 128   ;;  %s1801_s27 = smov 8   ;;  %vm802_vm0 = vcmask 7168  }
 0x1e7   : > { %1379 = dma.vmem_to_hbm [thread:$0]  (%p1993_p0), %s2246_s19, 2048, %s2243_s15, %s891_s16, %s1800_s13, %s1800_s13, %s1801_s27  }
 0x1e8   : > { %s2276_s17 = scalar_lea.vmem [#allocation13], %s2054_s20  ;;  %s2283_s12 = scalar_lea.vmem [#allocation14], %s2054_s20 }
 0x1e9   : > { %s951_s20 = sshll.u32 %s2276_s17, 4  ;;  %s2334_s16 = scalar_lea.hbm %s2445_s6, %s2237_s22  ;;  %s2336_s20 = int_to_ptr.vmem [resolvable:$true] %s951_s20 }
 0x1ea   : > { %s1660_s11 = scalar_lea.vmem %s2336_s20, 2048  ;;  %s1802_s23 = smov [#allocation13]  }
 0x1eb   : > { %p1661_p8 = scmp.ne.s32.totalorder %s2336_s20, %s1660_s11  ;;  %s1664_s10 = sshll.u32 %s1802_s23, 4  ;;  %s1665_s10 = int_to_ptr.vmem [resolvable:$false] %s1664_s10 }
 0x1ec   : > { %s1666_s30 = scalar_lea.vmem %s1665_s10, 4096  ;;  %p1667_p10 = scmp.lt.s32.totalorder %s2336_s20, %s1665_s10 }
 0x1ed   : > { %p1662_p11 = pnand %p1661_p8, %p1993_p0  ;;  %p1668_p12 = scmp.lt.s32.totalorder %s1666_s30, %s1660_s11 }
 0x1ef   : > { %p1663_p2 = pneg %p1662_p11  ;;  %p1669_p6 = por %p1668_p12, %p1667_p10 }
 0x1f1   : > { %p1670_p3 = pnand %p1669_p6, %p1663_p2 }
 0x211   : > { %v791_v26 = vpop.xlane.xlu0 %790  ;;  %v775_v27 = vpop.xlane.xlu1 %774 }
 0x212   : > { %813 = vst.msk [vmem:[%s2276_s17 + $0x50] sm:$0xff] %vm802_vm0, %v791_v26  ;;  %805 = vst.msk [vmem:[%s2276_s17 + $0x10] sm:$0xff] %vm802_vm0, %v775_v27 }
 0x215   : > { %v847_v28 = vpop.xlane.xlu0 %846  ;;  %v777_v29 = vpop.xlane.xlu1 %776 }
 0x216   : > { %876 = vst.msk [vmem:[%s2283_s12 + $0x10] sm:$0xff] %vm802_vm0, %v847_v28  ;;  %806 = vst.msk [vmem:[%s2276_s17 + $0x18] sm:$0xff] %vm802_vm0, %v777_v29 }
 0x219   : > { %v863_v30 = vpop.xlane.xlu0 %862  ;;  %v793_v31 = vpop.xlane.xlu1 %792 }
 0x21a   : > { %884 = vst.msk [vmem:[%s2283_s12 + $0x50] sm:$0xff] %vm802_vm0, %v863_v30  ;;  %814 = vst.msk [vmem:[%s2276_s17 + $0x58] sm:$0xff] %vm802_vm0, %v793_v31 }
 0x21d   : > { %v849_v32 = vpop.xlane.xlu1 %848  ;;  %v771_v33 = vpop.xlane.xlu0 %770 }
 0x21e   : > { %877 = vst.msk [vmem:[%s2283_s12 + $0x18] sm:$0xff] %vm802_vm0, %v849_v32  ;;  %803 = vst.msk [vmem:[%s2276_s17] sm:$0xff] %vm802_vm0, %v771_v33 }
 0x221   : > { %v865_v34 = vpop.xlane.xlu1 %864  ;;  %v787_v35 = vpop.xlane.xlu0 %786 }
 0x222   : > { %885 = vst.msk [vmem:[%s2283_s12 + $0x58] sm:$0xff] %vm802_vm0, %v865_v34  ;;  %811 = vst.msk [vmem:[%s2276_s17 + $0x40] sm:$0xff] %vm802_vm0, %v787_v35 }
 0x225   : > { %v789_v36 = vpop.xlane.xlu1 %788  ;;  %v843_v37 = vpop.xlane.xlu0 %842 }
 0x226   : > { %812 = vst.msk [vmem:[%s2276_s17 + $0x48] sm:$0xff] %vm802_vm0, %v789_v36  ;;  %874 = vst.msk [vmem:[%s2283_s12] sm:$0xff] %vm802_vm0, %v843_v37 }
 0x229   : > { %v845_v38 = vpop.xlane.xlu1 %844  ;;  %v859_v39 = vpop.xlane.xlu0 %858 }
 0x22a   : > { %875 = vst.msk [vmem:[%s2283_s12 + $0x8] sm:$0xff] %vm802_vm0, %v845_v38  ;;  %882 = vst.msk [vmem:[%s2283_s12 + $0x40] sm:$0xff] %vm802_vm0, %v859_v39 }
 0x22d   : > { %v861_v40 = vpop.xlane.xlu1 %860  ;;  %v773_v41 = vpop.xlane.xlu0 %772 }
 0x22e   : > { %883 = vst.msk [vmem:[%s2283_s12 + $0x48] sm:$0xff] %vm802_vm0, %v861_v40  ;;  %804 = vst.msk [vmem:[%s2276_s17 + $0x8] sm:$0xff] %vm802_vm0, %v773_v41 }
 0x231   : > { %v785_v42 = vpop.xlane.xlu1 %784  ;;  %v783_v43 = vpop.xlane.xlu0 %782 }
 0x232   : > { %810 = vst.msk [vmem:[%s2276_s17 + $0x38] sm:$0xff] %vm802_vm0, %v785_v42  ;;  %809 = vst.msk [vmem:[%s2276_s17 + $0x30] sm:$0xff] %vm802_vm0, %v783_v43 }
 0x235   : > { %v801_v44 = vpop.xlane.xlu1 %800  ;;  %v799_v45 = vpop.xlane.xlu0 %798 }
 0x236   : > { %818 = vst.msk [vmem:[%s2276_s17 + $0x78] sm:$0xff] %vm802_vm0, %v801_v44  ;;  %817 = vst.msk [vmem:[%s2276_s17 + $0x70] sm:$0xff] %vm802_vm0, %v799_v45 }
 0x239   : > { %v857_v46 = vpop.xlane.xlu1 %856  ;;  %v855_v47 = vpop.xlane.xlu0 %854 }
 0x23a   : > { %881 = vst.msk [vmem:[%s2283_s12 + $0x38] sm:$0xff] %vm802_vm0, %v857_v46  ;;  %880 = vst.msk [vmem:[%s2283_s12 + $0x30] sm:$0xff] %vm802_vm0, %v855_v47 }
 0x23d   : > { %v781_v48 = vpop.xlane.xlu1 %780  ;;  %v779_v49 = vpop.xlane.xlu0 %778 }
 0x23e   : > { %808 = vst.msk [vmem:[%s2276_s17 + $0x28] sm:$0xff] %vm802_vm0, %v781_v48  ;;  %807 = vst.msk [vmem:[%s2276_s17 + $0x20] sm:$0xff] %vm802_vm0, %v779_v49 }
 0x241   : > { %v797_v50 = vpop.xlane.xlu1 %796  ;;  %v795_v51 = vpop.xlane.xlu0 %794 }
 0x242   : > { %816 = vst.msk [vmem:[%s2276_s17 + $0x68] sm:$0xff] %vm802_vm0, %v797_v50  ;;  %815 = vst.msk [vmem:[%s2276_s17 + $0x60] sm:$0xff] %vm802_vm0, %v795_v51 }
 0x243   : > { %1673 = shalt.err (!%p1670_p3)
}
 0x244   : > { %s1674_s8 = scalar_lea.hbm %s2334_s16, 2048  ;;  %s1678_s15 = scalar_lea.hbm %s2445_s6, 6144 }
 0x245   : > { %p1675_p5 = scmp.ne.s32.totalorder %s2334_s16, %s1674_s8  ;;  %p1679_p13 = scmp.lt.u32.totalorder %s2334_s16, %s2445_s6 }
 0x246   : > { %p1680_p1 = scmp.lt.u32.totalorder %s1678_s15, %s1674_s8  ;;  %p1682_p8 = scmp.lt.u32.totalorder %s1674_s8, %s2334_s16 }
 0x247   : > { %p1676_p7 = pnand %p1675_p5, %p1993_p0 }
 0x248   : > { %p1681_p4 = por %p1680_p1, %p1679_p13 }
 0x249   : > { %p1677_p9 = pneg %p1676_p7 }
 0x24a   : > { %p1683_p11 = por %p1682_p8, %p1681_p4 }
 0x24c   : > { %p1684_p2 = pnand %p1683_p11, %p1677_p9 }
 0x24e   : > { %1687 = shalt.err (!%p1684_p2)
}
 0x24f   : > { %1381 = dma.vmem_to_hbm [thread:$0]  (%p1993_p0), %s2336_s20, 2048, %s2334_s16, %s2212_s24, %s1800_s13, %s1800_s13, %s1801_s27   ;;  %v853_v52 = vpop.xlane.xlu1 %852  ;;  %v851_v53 = vpop.xlane.xlu0 %850 }
 0x250   : > { %879 = vst.msk [vmem:[%s2283_s12 + $0x28] sm:$0xff] %vm802_vm0, %v853_v52  ;;  %878 = vst.msk [vmem:[%s2283_s12 + $0x20] sm:$0xff] %vm802_vm0, %v851_v53  ;;  %s967_s11 = sshll.u32 %s2283_s12, 4  ;;  %s2471_s8 = sld [smem:[#allocation24_spill]]  ;;  %s2382_s11 = int_to_ptr.vmem [resolvable:$true] %s967_s11 }
 0x251   : > { %s906_s24 = scalar_lea.sflag [#allocation15], %s2051_s18  ;;  %s1688_s20 = scalar_lea.vmem %s2382_s11, 2048 }
 0x252   : > { %p1689_p10 = scmp.ne.s32.totalorder %s2382_s11, %s1688_s20  ;;  %s1803_s16 = smov [#allocation14]  }
 0x253   : > { %v869_v54 = vpop.xlane.xlu1 %868  ;;  %v867_v55 = vpop.xlane.xlu0 %866 }
 0x254   : > { %887 = vst.msk [vmem:[%s2283_s12 + $0x68] sm:$0xff] %vm802_vm0, %v869_v54  ;;  %886 = vst.msk [vmem:[%s2283_s12 + $0x60] sm:$0xff] %vm802_vm0, %v867_v55  ;;  %p1690_p12 = pnand %p1689_p10, %p1993_p0 }
 0x256   : > { %s2380_s9 = scalar_lea.hbm %s2471_s8, %s2237_s22  ;;  %p1691_p6 = pneg %p1690_p12 }
 0x257   : > { %v873_v56 = vpop.xlane.xlu1 %872  ;;  %v871_v57 = vpop.xlane.xlu0 %870  ;;  %s1692_s22 = sshll.u32 %s1803_s16, 4  ;;  %s1693_s22 = int_to_ptr.vmem [resolvable:$false] %s1692_s22 }
 0x258   : > { %889 = vst.msk [vmem:[%s2283_s12 + $0x78] sm:$0xff] %vm802_vm0, %v873_v56  ;;  %888 = vst.msk [vmem:[%s2283_s12 + $0x70] sm:$0xff] %vm802_vm0, %v871_v57  ;;  %s1694_s17 = scalar_lea.vmem %s1693_s22, 4096  ;;  %p1695_p3 = scmp.lt.s32.totalorder %s2382_s11, %s1693_s22 }
 0x259   : > { %p1696_p5 = scmp.lt.s32.totalorder %s1694_s17, %s1688_s20 }
 0x25b   : > { %p1697_p7 = por %p1696_p5, %p1695_p3 }
 0x25d   : > { %p1698_p9 = pnand %p1697_p7, %p1691_p6 }
 0x25f   : > { %1701 = shalt.err (!%p1698_p9)
}
 0x260   : > { %s1702_s12 = scalar_lea.hbm %s2380_s9, 2048  ;;  %s1706_s23 = scalar_lea.hbm %s2471_s8, 6144 }
 0x261   : > { %p1703_p13 = scmp.ne.s32.totalorder %s2380_s9, %s1702_s12  ;;  %p1707_p8 = scmp.lt.u32.totalorder %s2380_s9, %s2471_s8 }
 0x262   : > { %p1708_p11 = scmp.lt.u32.totalorder %s1706_s23, %s1702_s12  ;;  %p1710_p10 = scmp.lt.u32.totalorder %s1702_s12, %s2380_s9 }
 0x263   : > { %p1704_p1 = pnand %p1703_p13, %p1993_p0 }
 0x264   : > { %p1709_p2 = por %p1708_p11, %p1707_p8 }
 0x265   : > { %p1705_p4 = pneg %p1704_p1 }
 0x266   : > { %p1711_p12 = por %p1710_p10, %p1709_p2 }
 0x268   : > { %p1712_p6 = pnand %p1711_p12, %p1705_p4 }
 0x26a   : > { %1715 = shalt.err (!%p1712_p6)
}
 0x26b   : > { %1382 = dma.vmem_to_hbm [thread:$0]  (%p1993_p0), %s2382_s11, 2048, %s2380_s9, %s906_s24, %s1800_s13, %s1800_s13, %s1801_s27  }
 0x26c PF: > { %s2472_s20 = sld [smem:[#allocation22_spill]]  ;;  %s2473_s16 = sld [smem:[#allocation23_spill]] }
 0x26d   : > { %p1421_p3 = scmp.ge.s32.totalorder %s1786_s29, 2 }
 0x272   : > { %s982_s22 = sand.u32 1, %s2472_s20   ;;  %p2474_p5 = scmp.ne.s32.totalorder %s2473_s16, 0 }
 0x273   : > { %s983_s17 = scalar_lea.sflag [#allocation4], %s982_s22 }
 0x274   : > { %p1402_p7 = pnand %p1421_p3, %p2474_p5 }
 0x276   : > { %1753 = dma.done.wait (!%p1402_p7), %s983_s17, 2048  }
 0x277   : > { %1755 = vsyncadd (!%p1402_p7), %s983_s17, 4294965248  ;;  %s2475_s14 = sadd.s32 4294967294, %s1786_s29  }
 0x278   : > { %s991_s12 = sand.u32 1, %s2475_s14  }
 0x279   : > { %s992_s15 = scalar_lea.sflag [#allocation12], %s991_s12 }
 0x27a   : > { %1757 = dma.done.wait (!%p1402_p7), %s992_s15, 3072  }
 0x27b   : > { %1759 = vsyncadd (!%p1402_p7), %s992_s15, 4294964224  ;;  %s1010_s18 = scalar_lea.sflag [#allocation15], %s982_s22 }
 0x27c   : > { %1761 = dma.done.wait (!%p1402_p7), %s1010_s18, 2048  }
 0x27d   : > { %1763 = vsyncadd (!%p1402_p7), %s1010_s18, 4294965248  ;;  %s32_s29 = sadd.s32 1, %s1786_s29   ;;  %s2476_s24 = smov %s1770_s25 }
 0x27e   : > { %p29_p0 = scmp.ge.s32.totalorder %s32_s29, 5   ;;  %s2477_s25 = smov %s1774_s26 }
 0x27f   : > { %s2478_s26 = smov %s2005_s21  ;;  %s2479_s27 = smov %s1782_s28 }
 0x280   : > { %s2480_s28 = smov %s2482_s7  ;;  %31 = sbr.rel (!%p29_p0) target bundleno = 14 (0xe), region = 151 }
 0x287   :  { %1015 = vsyncpa [#allocation3], 1 }
 0x288   :  { %1017 = vsyncpa [#allocation3 + $0x1], 1 }
 0x289   :  { %1018 = vsyncpa [#allocation6], 1 }
 0x28a   :  { %1019 = vsyncpa [#allocation9], 1 }
 0x28b   :  { %1020 = vsyncpa [#allocation4], 1 }
 0x28c   :  { %1022 = vsyncpa [#allocation4 + $0x1], 1 }
 0x28d   :  { %1023 = vsyncpa [#allocation12], 1 }
 0x28e   :  { %1025 = vsyncpa [#allocation12 + $0x1], 1 }
 0x28f   :  { %1026 = vsyncpa [#allocation15], 1 }
 0x290   :  { %1028 = vsyncpa [#allocation15 + $0x1], 1 }

</bundles_post_ra>
